<compile_context>
chip_gen: v6e
topology: v6e:2x2x1
jax: 0.10.0
libtpu: 0.0.40
codegen_flags: <defaults>
</compile_context>

<pallas_src>
import math

import jax
import jax.numpy as jnp
import numpy as np
from jax.experimental import pallas as pl
from jax.experimental.pallas import tpu as pltpu


# ---------------------------------------------------------------------------
# Host-side helpers
# ---------------------------------------------------------------------------

def _nearest_src_indices(d_in: int, d_out: int, upscaling: float) -> np.ndarray:
    """PyTorch 'nearest' source indices for an explicit scale_factor.

    Matches PyTorch's float path: scale = float(1.0 / scale_factor),
    src = min(floorf(float(dst) * scale), d_in - 1).
    """
    scale = np.float32(1.0 / float(upscaling))
    j = np.arange(d_out, dtype=np.float32)
    src = np.floor(j * scale).astype(np.int64)
    return np.clip(src, 0, d_in - 1).astype(np.int32)


def _vmem_budget_bytes():
    """(vmem_limit_bytes, per-slot in+out block byte budget), queried per device."""
    try:
        cap = int(pltpu.get_tpu_info().vmem_capacity_bytes)
    except Exception:  # not on TPU / API unavailable -> conservative (v7x) default
        cap = 64 * 1024 * 1024
    # Headroom under physical VMEM: ~48 MiB on v7x (64 MiB/TC), 64 MiB on v5e/v6e.
    vmem_limit = max(32 * 1024 * 1024, min(cap - 16 * 1024 * 1024, 64 * 1024 * 1024))
    # Four buffers live (2x input, 2x output): each (in+out) slot gets < half the
    # limit, leaving margin for Mosaic's internal scratch.
    slot_budget = int(vmem_limit * 0.45)
    return vmem_limit, slot_budget


def _full_depth_tiles(rows, d_in, d_out, hw, itemsize, slot_budget):
    """Pick (r_tile, hw_tile) for blocks carrying the whole depth axis.

    Returns None if even a minimal (1 row, 128-lane) block would not fit."""
    per_row_col = (d_in + d_out) * itemsize            # in+out bytes per (row, lane)
    if per_row_col * min(hw, 128) > slot_budget:
        return None                                    # depth too large for this path
    per_row_full = per_row_col * hw
    if per_row_full <= slot_budget:
        hw_tile = hw                                   # full lane dim (always legal)
        r_tile = min(rows, max(1, slot_budget // per_row_full))
        if r_tile >= 8:
            r_tile = (r_tile // 8) * 8                 # keep row tiles 8-friendly
    else:
        # Tile H*W in multiples of 128 lanes; keep the row tile small.
        hw_tile = min(hw, max(128, (slot_budget // per_row_col) // 128 * 128))
        r_tile = min(rows, max(1, slot_budget // (per_row_col * hw_tile)))
    return r_tile, hw_tile


# ---------------------------------------------------------------------------
# Primary path: full-depth blocks, static in-kernel depth replication
# ---------------------------------------------------------------------------

def _make_full_depth_kernel(src_idx):
    src_idx = tuple(int(s) for s in src_idx)

    def kernel(x_ref, o_ref):
        # x_ref: (r_tile, d_in, hw_tile), o_ref: (r_tile, d_out, hw_tile).
        # Statically unrolled nearest gather along the (sublane) depth axis: each
        # source depth slice is loaded once and stored to every output depth that
        # maps to it (integer factors -> exact runs of length U).
        n = len(src_idx)
        j = 0
        while j < n:
            s = src_idx[j]
            k = j
            while k < n and src_idx[k] == s:
                k += 1
            val = x_ref[:, s, :]
            for t in range(j, k):
                o_ref[:, t, :] = val
            j = k

    return kernel


def _upsample_full_depth(x2, src_idx, r_tile, hw_tile, vmem_limit):
    rows, d_in, hw = x2.shape
    d_out = int(src_idx.shape[0])
    grid = (pl.cdiv(rows, r_tile), pl.cdiv(hw, hw_tile))
    return pl.pallas_call(
        _make_full_depth_kernel(src_idx),
        out_shape=jax.ShapeDtypeStruct((rows, d_out, hw), x2.dtype),
        grid_spec=pltpu.PrefetchScalarGridSpec(
            num_scalar_prefetch=0,
            grid=grid,
            in_specs=[pl.BlockSpec((r_tile, d_in, hw_tile), lambda r, c: (r, 0, c))],
            out_specs=pl.BlockSpec((r_tile, d_out, hw_tile), lambda r, c: (r, 0, c)),
        ),
        compiler_params=pltpu.CompilerParams(
            # No accumulation anywhere: both grid axes are independent, so v7x may
            # shard either across its two TensorCores.
            dimension_semantics=("parallel", "parallel"),
            vmem_limit_bytes=vmem_limit,
        ),
    )(x2)


# ---------------------------------------------------------------------------
# Fallback path: one grid step per output depth, scalar-prefetched source table
# (used only when the depth axis is too large to keep resident in VMEM)
# ---------------------------------------------------------------------------

def _copy_depth_kernel(src_tbl_ref, x_ref, o_ref):
    del src_tbl_ref  # consumed by the index_maps only
    o_ref[...] = x_ref[...]


def _upsample_per_depth(x2, src_idx, vmem_limit, slot_budget):
    rows, d_in, hw = x2.shape
    d_out = int(src_idx.shape[0])
    itemsize = x2.dtype.itemsize
    # Sublane packing for this dtype (8 for f32, 16 for bf16, 32 for int8/fp8).
    pack = max(1, 4 // max(1, itemsize)) * 8
    max_rows = max(1, (slot_budget // 2) // max(1, hw * itemsize))
    r_tile = min(rows, max_rows)
    if r_tile >= pack:
        r_tile = (r_tile // pack) * pack
    grid = (pl.cdiv(rows, r_tile), d_out)

    def in_index_map(r, j, src_ref):
        # Source depth from the prefetched SMEM table; repeated indices let the
        # pipeline elide redundant input DMAs across consecutive depth steps.
        return (r, src_ref[j], 0)

    def out_index_map(r, j, src_ref):
        return (r, j, 0)

    block = (r_tile, None, hw)  # depth squeezed -> kernel sees a dense (r_tile, hw) tile
    return pl.pallas_call(
        _copy_depth_kernel,
        out_shape=jax.ShapeDtypeStruct((rows, d_out, hw), x2.dtype),
        grid_spec=pltpu.PrefetchScalarGridSpec(
            num_scalar_prefetch=1,
            grid=grid,
            in_specs=[pl.BlockSpec(block, in_index_map)],
            out_specs=pl.BlockSpec(block, out_index_map),
        ),
        compiler_params=pltpu.CompilerParams(
            # Keep the depth sweep sequential per core so a v7x megacore split lands
            # on the row axis and preserves the input block-revisit DMA dedup.
            dimension_semantics=("parallel", "arbitrary"),
            vmem_limit_bytes=vmem_limit,
        ),
    )(jnp.asarray(src_idx, dtype=jnp.int32), x2)


# ---------------------------------------------------------------------------
# Public wrapper
# ---------------------------------------------------------------------------

def upscaling_block_single_node(x: jnp.ndarray, upscaling: float) -> jnp.ndarray:
    """Nearest-neighbor upsampling along the depth axis of an NCDHW tensor.

    Matches torch.nn.Upsample(scale_factor=(upscaling, 1, 1), mode='nearest').
    """
    n, c, d_in, h, w = x.shape
    d_out = int(math.floor(d_in * float(upscaling)))  # PyTorch output-size rule
    hw = h * w
    rows = n * c

    src_idx = _nearest_src_indices(d_in, d_out, upscaling)

    # Free (contiguous) reshape: (N, C, D, H, W) -> (N*C, D, H*W).
    x2 = x.reshape(rows, d_in, hw)

    vmem_limit, slot_budget = _vmem_budget_bytes()
    tiles = _full_depth_tiles(rows, d_in, d_out, hw, x.dtype.itemsize, slot_budget)

    if tiles is not None and d_out <= 512:
        out = _upsample_full_depth(x2, src_idx, tiles[0], tiles[1], vmem_limit)
    else:
        # TODO(synk): for huge D_out a chunked-depth variant (several output depths
        # per block) would combine both paths; fall back to per-depth blocks here.
        out = _upsample_per_depth(x2, src_idx, vmem_limit, slot_budget)

    # Free reshape back: (N*C, D_out, H*W) -> (N, C, D_out, H, W).
    return out.reshape(n, c, d_out, h, w)


if __name__ == "__main__":
    key = jax.random.PRNGKey(0)

    # Small 5D input (N, C, D, H, W); the module has no learnable parameters.
    n, c, d, h, w = 2, 4, 8, 16, 16
    x = jax.random.normal(key, (n, c, d, h, w), dtype=jnp.float32)

    # Integer scale factor: must be an exact depth repeat.
    upscaling = 2.0
    out = jax.block_until_ready(upscaling_block_single_node(x, upscaling))
    ref = jnp.repeat(x, int(upscaling), axis=2)
    assert out.shape == (n, c, int(d * upscaling), h, w), out.shape
    assert bool(jnp.array_equal(out, ref)), "mismatch vs. integer nearest-upsample reference"

    # Fractional scale factor: check against a gather using the same nearest rule.
    upscaling_f = 1.5
    d_out_f = int(math.floor(d * upscaling_f))
    out_f = jax.block_until_ready(upscaling_block_single_node(x, upscaling_f))
    src_f = _nearest_src_indices(d, d_out_f, upscaling_f)
    ref_f = jnp.take(x, jnp.asarray(src_f), axis=2)
    assert out_f.shape == (n, c, d_out_f, h, w), out_f.shape
    assert bool(jnp.array_equal(out_f, ref_f)), "mismatch vs. fractional nearest-upsample reference"

    print("KERNEL_OK")
</pallas_src>

<mosaic_0001>
module attributes {stable_mosaic.version = 11 : i64} {
  func.func @kernel(%arg0: i32, %arg1: i32, %arg2: memref<8x8x256xf32, #tpu.memory_space<vmem>>, %arg3: memref<8x16x256xf32, #tpu.memory_space<vmem>>) attributes {dimension_semantics = [#tpu.dimension_semantics<parallel>, #tpu.dimension_semantics<parallel>], iteration_bounds = array<i64: 1, 1>, scalar_prefetch = 0 : i64, scratch_operands = 0 : i64, tpu.core_type = #tpu.core_type<tc>, window_params = [{transform_indices = @transform_0, window_bounds = array<i64: 8, 8, 256>}, {transform_indices = @transform_1, window_bounds = array<i64: 8, 16, 256>}]} {
    %c0 = arith.constant 0 : index
    %c0_0 = arith.constant 0 : index
    %c0_1 = arith.constant 0 : index
    %0 = vector.load %arg2[%c0, %c0_0, %c0_1] : memref<8x8x256xf32, #tpu.memory_space<vmem>>, vector<8x1x256xf32>
    %1 = vector.shape_cast %0 : vector<8x1x256xf32> to vector<8x256xf32>
    %c0_2 = arith.constant 0 : index
    %c0_3 = arith.constant 0 : index
    %c0_4 = arith.constant 0 : index
    %2 = vector.load %arg3[%c0_2, %c0_3, %c0_4] : memref<8x16x256xf32, #tpu.memory_space<vmem>>, vector<8x1x256xf32>
    %3 = vector.shape_cast %2 : vector<8x1x256xf32> to vector<8x256xf32>
    %4 = vector.shape_cast %1 : vector<8x256xf32> to vector<8x1x256xf32>
    tpu.vector_store %arg3[%c0_2, %c0_3, %c0_4], %4 {strides = array<i32>} : memref<8x16x256xf32, #tpu.memory_space<vmem>>, vector<8x1x256xf32>,
    %c0_5 = arith.constant 0 : index
    %c1 = arith.constant 1 : index
    %c0_6 = arith.constant 0 : index
    %5 = vector.load %arg3[%c0_5, %c1, %c0_6] : memref<8x16x256xf32, #tpu.memory_space<vmem>>, vector<8x1x256xf32>
    %6 = vector.shape_cast %5 : vector<8x1x256xf32> to vector<8x256xf32>
    %7 = vector.shape_cast %1 : vector<8x256xf32> to vector<8x1x256xf32>
    tpu.vector_store %arg3[%c0_5, %c1, %c0_6], %7 {strides = array<i32>} : memref<8x16x256xf32, #tpu.memory_space<vmem>>, vector<8x1x256xf32>,
    %c0_7 = arith.constant 0 : index
    %c1_8 = arith.constant 1 : index
    %c0_9 = arith.constant 0 : index
    %8 = vector.load %arg2[%c0_7, %c1_8, %c0_9] : memref<8x8x256xf32, #tpu.memory_space<vmem>>, vector<8x1x256xf32>
    %9 = vector.shape_cast %8 : vector<8x1x256xf32> to vector<8x256xf32>
    %c0_10 = arith.constant 0 : index
    %c2 = arith.constant 2 : index
    %c0_11 = arith.constant 0 : index
    %10 = vector.load %arg3[%c0_10, %c2, %c0_11] : memref<8x16x256xf32, #tpu.memory_space<vmem>>, vector<8x1x256xf32>
    %11 = vector.shape_cast %10 : vector<8x1x256xf32> to vector<8x256xf32>
    %12 = vector.shape_cast %9 : vector<8x256xf32> to vector<8x1x256xf32>
    tpu.vector_store %arg3[%c0_10, %c2, %c0_11], %12 {strides = array<i32>} : memref<8x16x256xf32, #tpu.memory_space<vmem>>, vector<8x1x256xf32>,
    %c0_12 = arith.constant 0 : index
    %c3 = arith.constant 3 : index
    %c0_13 = arith.constant 0 : index
    %13 = vector.load %arg3[%c0_12, %c3, %c0_13] : memref<8x16x256xf32, #tpu.memory_space<vmem>>, vector<8x1x256xf32>
    %14 = vector.shape_cast %13 : vector<8x1x256xf32> to vector<8x256xf32>
    %15 = vector.shape_cast %9 : vector<8x256xf32> to vector<8x1x256xf32>
    tpu.vector_store %arg3[%c0_12, %c3, %c0_13], %15 {strides = array<i32>} : memref<8x16x256xf32, #tpu.memory_space<vmem>>, vector<8x1x256xf32>,
    %c0_14 = arith.constant 0 : index
    %c2_15 = arith.constant 2 : index
    %c0_16 = arith.constant 0 : index
    %16 = vector.load %arg2[%c0_14, %c2_15, %c0_16] : memref<8x8x256xf32, #tpu.memory_space<vmem>>, vector<8x1x256xf32>
    %17 = vector.shape_cast %16 : vector<8x1x256xf32> to vector<8x256xf32>
    %c0_17 = arith.constant 0 : index
    %c4 = arith.constant 4 : index
    %c0_18 = arith.constant 0 : index
    %18 = vector.load %arg3[%c0_17, %c4, %c0_18] : memref<8x16x256xf32, #tpu.memory_space<vmem>>, vector<8x1x256xf32>
    %19 = vector.shape_cast %18 : vector<8x1x256xf32> to vector<8x256xf32>
    %20 = vector.shape_cast %17 : vector<8x256xf32> to vector<8x1x256xf32>
    tpu.vector_store %arg3[%c0_17, %c4, %c0_18], %20 {strides = array<i32>} : memref<8x16x256xf32, #tpu.memory_space<vmem>>, vector<8x1x256xf32>,
    %c0_19 = arith.constant 0 : index
    %c5 = arith.constant 5 : index
    %c0_20 = arith.constant 0 : index
    %21 = vector.load %arg3[%c0_19, %c5, %c0_20] : memref<8x16x256xf32, #tpu.memory_space<vmem>>, vector<8x1x256xf32>
    %22 = vector.shape_cast %21 : vector<8x1x256xf32> to vector<8x256xf32>
    %23 = vector.shape_cast %17 : vector<8x256xf32> to vector<8x1x256xf32>
    tpu.vector_store %arg3[%c0_19, %c5, %c0_20], %23 {strides = array<i32>} : memref<8x16x256xf32, #tpu.memory_space<vmem>>, vector<8x1x256xf32>,
    %c0_21 = arith.constant 0 : index
    %c3_22 = arith.constant 3 : index
    %c0_23 = arith.constant 0 : index
    %24 = vector.load %arg2[%c0_21, %c3_22, %c0_23] : memref<8x8x256xf32, #tpu.memory_space<vmem>>, vector<8x1x256xf32>
    %25 = vector.shape_cast %24 : vector<8x1x256xf32> to vector<8x256xf32>
    %c0_24 = arith.constant 0 : index
    %c6 = arith.constant 6 : index
    %c0_25 = arith.constant 0 : index
    %26 = vector.load %arg3[%c0_24, %c6, %c0_25] : memref<8x16x256xf32, #tpu.memory_space<vmem>>, vector<8x1x256xf32>
    %27 = vector.shape_cast %26 : vector<8x1x256xf32> to vector<8x256xf32>
    %28 = vector.shape_cast %25 : vector<8x256xf32> to vector<8x1x256xf32>
    tpu.vector_store %arg3[%c0_24, %c6, %c0_25], %28 {strides = array<i32>} : memref<8x16x256xf32, #tpu.memory_space<vmem>>, vector<8x1x256xf32>,
    %c0_26 = arith.constant 0 : index
    %c7 = arith.constant 7 : index
    %c0_27 = arith.constant 0 : index
    %29 = vector.load %arg3[%c0_26, %c7, %c0_27] : memref<8x16x256xf32, #tpu.memory_space<vmem>>, vector<8x1x256xf32>
    %30 = vector.shape_cast %29 : vector<8x1x256xf32> to vector<8x256xf32>
    %31 = vector.shape_cast %25 : vector<8x256xf32> to vector<8x1x256xf32>
    tpu.vector_store %arg3[%c0_26, %c7, %c0_27], %31 {strides = array<i32>} : memref<8x16x256xf32, #tpu.memory_space<vmem>>, vector<8x1x256xf32>,
    %c0_28 = arith.constant 0 : index
    %c4_29 = arith.constant 4 : index
    %c0_30 = arith.constant 0 : index
    %32 = vector.load %arg2[%c0_28, %c4_29, %c0_30] : memref<8x8x256xf32, #tpu.memory_space<vmem>>, vector<8x1x256xf32>
    %33 = vector.shape_cast %32 : vector<8x1x256xf32> to vector<8x256xf32>
    %c0_31 = arith.constant 0 : index
    %c8 = arith.constant 8 : index
    %c0_32 = arith.constant 0 : index
    %34 = vector.load %arg3[%c0_31, %c8, %c0_32] : memref<8x16x256xf32, #tpu.memory_space<vmem>>, vector<8x1x256xf32>
    %35 = vector.shape_cast %34 : vector<8x1x256xf32> to vector<8x256xf32>
    %36 = vector.shape_cast %33 : vector<8x256xf32> to vector<8x1x256xf32>
    tpu.vector_store %arg3[%c0_31, %c8, %c0_32], %36 {strides = array<i32>} : memref<8x16x256xf32, #tpu.memory_space<vmem>>, vector<8x1x256xf32>,
    %c0_33 = arith.constant 0 : index
    %c9 = arith.constant 9 : index
    %c0_34 = arith.constant 0 : index
    %37 = vector.load %arg3[%c0_33, %c9, %c0_34] : memref<8x16x256xf32, #tpu.memory_space<vmem>>, vector<8x1x256xf32>
    %38 = vector.shape_cast %37 : vector<8x1x256xf32> to vector<8x256xf32>
    %39 = vector.shape_cast %33 : vector<8x256xf32> to vector<8x1x256xf32>
    tpu.vector_store %arg3[%c0_33, %c9, %c0_34], %39 {strides = array<i32>} : memref<8x16x256xf32, #tpu.memory_space<vmem>>, vector<8x1x256xf32>,
    %c0_35 = arith.constant 0 : index
    %c5_36 = arith.constant 5 : index
    %c0_37 = arith.constant 0 : index
    %40 = vector.load %arg2[%c0_35, %c5_36, %c0_37] : memref<8x8x256xf32, #tpu.memory_space<vmem>>, vector<8x1x256xf32>
    %41 = vector.shape_cast %40 : vector<8x1x256xf32> to vector<8x256xf32>
    %c0_38 = arith.constant 0 : index
    %c10 = arith.constant 10 : index
    %c0_39 = arith.constant 0 : index
    %42 = vector.load %arg3[%c0_38, %c10, %c0_39] : memref<8x16x256xf32, #tpu.memory_space<vmem>>, vector<8x1x256xf32>
    %43 = vector.shape_cast %42 : vector<8x1x256xf32> to vector<8x256xf32>
    %44 = vector.shape_cast %41 : vector<8x256xf32> to vector<8x1x256xf32>
    tpu.vector_store %arg3[%c0_38, %c10, %c0_39], %44 {strides = array<i32>} : memref<8x16x256xf32, #tpu.memory_space<vmem>>, vector<8x1x256xf32>,
    %c0_40 = arith.constant 0 : index
    %c11 = arith.constant 11 : index
    %c0_41 = arith.constant 0 : index
    %45 = vector.load %arg3[%c0_40, %c11, %c0_41] : memref<8x16x256xf32, #tpu.memory_space<vmem>>, vector<8x1x256xf32>
    %46 = vector.shape_cast %45 : vector<8x1x256xf32> to vector<8x256xf32>
    %47 = vector.shape_cast %41 : vector<8x256xf32> to vector<8x1x256xf32>
    tpu.vector_store %arg3[%c0_40, %c11, %c0_41], %47 {strides = array<i32>} : memref<8x16x256xf32, #tpu.memory_space<vmem>>, vector<8x1x256xf32>,
    %c0_42 = arith.constant 0 : index
    %c6_43 = arith.constant 6 : index
    %c0_44 = arith.constant 0 : index
    %48 = vector.load %arg2[%c0_42, %c6_43, %c0_44] : memref<8x8x256xf32, #tpu.memory_space<vmem>>, vector<8x1x256xf32>
    %49 = vector.shape_cast %48 : vector<8x1x256xf32> to vector<8x256xf32>
    %c0_45 = arith.constant 0 : index
    %c12 = arith.constant 12 : index
    %c0_46 = arith.constant 0 : index
    %50 = vector.load %arg3[%c0_45, %c12, %c0_46] : memref<8x16x256xf32, #tpu.memory_space<vmem>>, vector<8x1x256xf32>
    %51 = vector.shape_cast %50 : vector<8x1x256xf32> to vector<8x256xf32>
    %52 = vector.shape_cast %49 : vector<8x256xf32> to vector<8x1x256xf32>
    tpu.vector_store %arg3[%c0_45, %c12, %c0_46], %52 {strides = array<i32>} : memref<8x16x256xf32, #tpu.memory_space<vmem>>, vector<8x1x256xf32>,
    %c0_47 = arith.constant 0 : index
    %c13 = arith.constant 13 : index
    %c0_48 = arith.constant 0 : index
    %53 = vector.load %arg3[%c0_47, %c13, %c0_48] : memref<8x16x256xf32, #tpu.memory_space<vmem>>, vector<8x1x256xf32>
    %54 = vector.shape_cast %53 : vector<8x1x256xf32> to vector<8x256xf32>
    %55 = vector.shape_cast %49 : vector<8x256xf32> to vector<8x1x256xf32>
    tpu.vector_store %arg3[%c0_47, %c13, %c0_48], %55 {strides = array<i32>} : memref<8x16x256xf32, #tpu.memory_space<vmem>>, vector<8x1x256xf32>,
    %c0_49 = arith.constant 0 : index
    %c7_50 = arith.constant 7 : index
    %c0_51 = arith.constant 0 : index
    %56 = vector.load %arg2[%c0_49, %c7_50, %c0_51] : memref<8x8x256xf32, #tpu.memory_space<vmem>>, vector<8x1x256xf32>
    %57 = vector.shape_cast %56 : vector<8x1x256xf32> to vector<8x256xf32>
    %c0_52 = arith.constant 0 : index
    %c14 = arith.constant 14 : index
    %c0_53 = arith.constant 0 : index
    %58 = vector.load %arg3[%c0_52, %c14, %c0_53] : memref<8x16x256xf32, #tpu.memory_space<vmem>>, vector<8x1x256xf32>
    %59 = vector.shape_cast %58 : vector<8x1x256xf32> to vector<8x256xf32>
    %60 = vector.shape_cast %57 : vector<8x256xf32> to vector<8x1x256xf32>
    tpu.vector_store %arg3[%c0_52, %c14, %c0_53], %60 {strides = array<i32>} : memref<8x16x256xf32, #tpu.memory_space<vmem>>, vector<8x1x256xf32>,
    %c0_54 = arith.constant 0 : index
    %c15 = arith.constant 15 : index
    %c0_55 = arith.constant 0 : index
    %61 = vector.load %arg3[%c0_54, %c15, %c0_55] : memref<8x16x256xf32, #tpu.memory_space<vmem>>, vector<8x1x256xf32>
    %62 = vector.shape_cast %61 : vector<8x1x256xf32> to vector<8x256xf32>
    %63 = vector.shape_cast %57 : vector<8x256xf32> to vector<8x1x256xf32>
    tpu.vector_store %arg3[%c0_54, %c15, %c0_55], %63 {strides = array<i32>} : memref<8x16x256xf32, #tpu.memory_space<vmem>>, vector<8x1x256xf32>,
    return
  }
  func.func @transform_0(%arg0: i32, %arg1: i32) -> (i32, i32, i32) {
    %c0_i32 = arith.constant 0 : i32
    %c0_i32_0 = arith.constant 0 : i32
    return %arg0, %c0_i32, %arg1 : i32, i32, i32
  }
  func.func @transform_1(%arg0: i32, %arg1: i32) -> (i32, i32, i32) {
    %c0_i32 = arith.constant 0 : i32
    %c0_i32_0 = arith.constant 0 : i32
    return %arg0, %c0_i32, %arg1 : i32, i32, i32
  }
}

</mosaic_0001>

<bundles_post_ra>
// kernel: tpu_custom_call.1
= control target key start
LH: loop header
LB: loop body
LE: loop exit
PB: predicated region body
PF: predicated region fallthrough
CT: control target
= control target key end

     0   :  { %6 = vsyncpa [#allocation3], 0  ;;  %s891_s0 = inlined_call_operand.hbm [shape: f32[8,8,256], index: 0, kind: input, shape index: {}]   ;;  %s892_s1 = inlined_call_operand.hbm [shape: f32[8,16,256], index: 1, kind: output, shape index: {}]  }
   0x1   :  { %7 = vsyncpa [#allocation4], 0  ;;  %s602_s6 = smov [#allocation2]  }
   0x2   :  { %s13_s7 = sshll.u32 %s602_s6, 4  ;;  %s14_s7 = int_to_ptr.vmem [resolvable:$true] %s13_s7 }
   0x3   :  { %s566_s8 = scalar_lea.vmem %s14_s7, 2048  ;;  %p571_p1 = scmp.lt.s32.totalorder %s14_s7, %s14_s7 }
   0x4   :  { %p567_p0 = scmp.ne.s32.totalorder %s14_s7, %s566_s8  ;;  %p572_p2 = scmp.lt.s32.totalorder %s566_s8, %s566_s8 }
   0x6   :  { %p573_p3 = por %p572_p2, %p571_p1 }
   0x8   :  { %p574_p4 = pnand %p573_p3, %p567_p0 }
   0xa   :  { %577 = shalt.err (!%p574_p4)
}
   0xb   :  { %s603_s9 = smov 256   ;;  %s604_s10 = smov 16  }
   0xc   :  { %19 = dma.hbm_to_vmem [thread:$0]  %s891_s0, 2048, %s14_s7, [#allocation3], %s603_s9, %s603_s9, %s604_s10  }
   0xd   :  { %598 = dma.done.wait [#allocation3], 2048  }
   0xe   :  { %599 = vsyncadd [#allocation3], 4294965248  ;;  %v38_v0 = vlaneseq  ;;  %s605_s13 = smov [#allocation5]   ;;  %v23_v2 = vld [vmem:[#allocation2] ss:$8 sm:$0x3] }
   0xf   :  { %s626_s14 = sshll.u32 %s605_s13, 4  ;;  %v25_v3 = vld [vmem:[#allocation2 + $0x10] ss:$8 sm:$0x3]  ;;  %s543_s14 = int_to_ptr.vmem [resolvable:$true] %s626_s14 }
  0x10   :  { %vm622_vm0 = vcmp.lt.s32.totalorder %v38_v0, 256  ;;  %v27_v4 = vld [vmem:[#allocation2 + $0x20] ss:$8 sm:$0x3]  ;;  %s578_s0 = scalar_lea.vmem %s543_s14, 4096  ;;  %p583_p6 = scmp.lt.s32.totalorder %s543_s14, %s543_s14 }
  0x11   :  { %42 = vst.msk [vmem:[#allocation5] ss:$8 sm:$0x3] %vm622_vm0, %v23_v2  ;;  %66 = vst.msk [vmem:[#allocation5 + $0x1] ss:$8 sm:$0x3] %vm622_vm0, %v23_v2  ;;  %p579_p5 = scmp.ne.s32.totalorder %s543_s14, %s578_s0  ;;  %p584_p7 = scmp.lt.s32.totalorder %s578_s0, %s578_s0 }
  0x12   :  { %45 = vst.msk [vmem:[#allocation5 + $0x20] ss:$8 sm:$0x3] %vm622_vm0, %v25_v3  ;;  %69 = vst.msk [vmem:[#allocation5 + $0x21] ss:$8 sm:$0x3] %vm622_vm0, %v25_v3 }
  0x13   :  { %v29_v5 = vld [vmem:[#allocation2 + $0x30] ss:$8 sm:$0x3]  ;;  %48 = vst.msk [vmem:[#allocation5 + $0x40] ss:$8 sm:$0x3] %vm622_vm0, %v27_v4  ;;  %p585_p8 = por %p584_p7, %p583_p6 }
  0x14   :  { %72 = vst.msk [vmem:[#allocation5 + $0x41] ss:$8 sm:$0x3] %vm622_vm0, %v27_v4  ;;  %51 = vst.msk [vmem:[#allocation5 + $0x60] ss:$8 sm:$0x3] %vm622_vm0, %v29_v5 }
  0x15   :  { %75 = vst.msk [vmem:[#allocation5 + $0x61] ss:$8 sm:$0x3] %vm622_vm0, %v29_v5  ;;  %v31_v6 = vld [vmem:[#allocation2 + $0x40] ss:$8 sm:$0x3]  ;;  %p586_p9 = pnand %p585_p8, %p579_p5 }
  0x16   :  { %v33_v7 = vld [vmem:[#allocation2 + $0x50] ss:$8 sm:$0x3]  ;;  %54 = vst.msk [vmem:[#allocation5 + $0x80] ss:$8 sm:$0x3] %vm622_vm0, %v31_v6 }
  0x17   :  { %78 = vst.msk [vmem:[#allocation5 + $0x81] ss:$8 sm:$0x3] %vm622_vm0, %v31_v6  ;;  %57 = vst.msk [vmem:[#allocation5 + $0xa0] ss:$8 sm:$0x3] %vm622_vm0, %v33_v7 }
  0x18   :  { %81 = vst.msk [vmem:[#allocation5 + $0xa1] ss:$8 sm:$0x3] %vm622_vm0, %v33_v7  ;;  %v35_v8 = vld [vmem:[#allocation2 + $0x60] ss:$8 sm:$0x3] }
  0x19   :  { %v37_v9 = vld [vmem:[#allocation2 + $0x70] ss:$8 sm:$0x3]  ;;  %60 = vst.msk [vmem:[#allocation5 + $0xc0] ss:$8 sm:$0x3] %vm622_vm0, %v35_v8 }
  0x1a   :  { %84 = vst.msk [vmem:[#allocation5 + $0xc1] ss:$8 sm:$0x3] %vm622_vm0, %v35_v8  ;;  %63 = vst.msk [vmem:[#allocation5 + $0xe0] ss:$8 sm:$0x3] %vm622_vm0, %v37_v9 }
  0x1b   :  { %87 = vst.msk [vmem:[#allocation5 + $0xe1] ss:$8 sm:$0x3] %vm622_vm0, %v37_v9  ;;  %v90_v10 = vld [vmem:[#allocation2 + $0x1] ss:$8 sm:$0x3] }
  0x1c   :  { %v92_v11 = vld [vmem:[#allocation2 + $0x11] ss:$8 sm:$0x3]  ;;  %106 = vst.msk [vmem:[#allocation5 + $0x2] ss:$8 sm:$0x3] %vm622_vm0, %v90_v10 }
  0x1d   :  { %130 = vst.msk [vmem:[#allocation5 + $0x3] ss:$8 sm:$0x3] %vm622_vm0, %v90_v10  ;;  %109 = vst.msk [vmem:[#allocation5 + $0x22] ss:$8 sm:$0x3] %vm622_vm0, %v92_v11 }
  0x1e   :  { %133 = vst.msk [vmem:[#allocation5 + $0x23] ss:$8 sm:$0x3] %vm622_vm0, %v92_v11  ;;  %v94_v12 = vld [vmem:[#allocation2 + $0x21] ss:$8 sm:$0x3] }
  0x1f   :  { %v96_v13 = vld [vmem:[#allocation2 + $0x31] ss:$8 sm:$0x3]  ;;  %112 = vst.msk [vmem:[#allocation5 + $0x42] ss:$8 sm:$0x3] %vm622_vm0, %v94_v12 }
  0x20   :  { %136 = vst.msk [vmem:[#allocation5 + $0x43] ss:$8 sm:$0x3] %vm622_vm0, %v94_v12  ;;  %115 = vst.msk [vmem:[#allocation5 + $0x62] ss:$8 sm:$0x3] %vm622_vm0, %v96_v13 }
  0x21   :  { %139 = vst.msk [vmem:[#allocation5 + $0x63] ss:$8 sm:$0x3] %vm622_vm0, %v96_v13  ;;  %v98_v14 = vld [vmem:[#allocation2 + $0x41] ss:$8 sm:$0x3] }
  0x22   :  { %v100_v15 = vld [vmem:[#allocation2 + $0x51] ss:$8 sm:$0x3]  ;;  %118 = vst.msk [vmem:[#allocation5 + $0x82] ss:$8 sm:$0x3] %vm622_vm0, %v98_v14 }
  0x23   :  { %142 = vst.msk [vmem:[#allocation5 + $0x83] ss:$8 sm:$0x3] %vm622_vm0, %v98_v14  ;;  %121 = vst.msk [vmem:[#allocation5 + $0xa2] ss:$8 sm:$0x3] %vm622_vm0, %v100_v15 }
  0x24   :  { %145 = vst.msk [vmem:[#allocation5 + $0xa3] ss:$8 sm:$0x3] %vm622_vm0, %v100_v15  ;;  %v102_v16 = vld [vmem:[#allocation2 + $0x61] ss:$8 sm:$0x3] }
  0x25   :  { %v104_v17 = vld [vmem:[#allocation2 + $0x71] ss:$8 sm:$0x3]  ;;  %124 = vst.msk [vmem:[#allocation5 + $0xc2] ss:$8 sm:$0x3] %vm622_vm0, %v102_v16 }
  0x26   :  { %148 = vst.msk [vmem:[#allocation5 + $0xc3] ss:$8 sm:$0x3] %vm622_vm0, %v102_v16  ;;  %127 = vst.msk [vmem:[#allocation5 + $0xe2] ss:$8 sm:$0x3] %vm622_vm0, %v104_v17 }
  0x27   :  { %151 = vst.msk [vmem:[#allocation5 + $0xe3] ss:$8 sm:$0x3] %vm622_vm0, %v104_v17  ;;  %v154_v18 = vld [vmem:[#allocation2 + $0x2] ss:$8 sm:$0x3] }
  0x28   :  { %v156_v19 = vld [vmem:[#allocation2 + $0x12] ss:$8 sm:$0x3]  ;;  %170 = vst.msk [vmem:[#allocation5 + $0x4] ss:$8 sm:$0x3] %vm622_vm0, %v154_v18 }
  0x29   :  { %194 = vst.msk [vmem:[#allocation5 + $0x5] ss:$8 sm:$0x3] %vm622_vm0, %v154_v18  ;;  %173 = vst.msk [vmem:[#allocation5 + $0x24] ss:$8 sm:$0x3] %vm622_vm0, %v156_v19 }
  0x2a   :  { %197 = vst.msk [vmem:[#allocation5 + $0x25] ss:$8 sm:$0x3] %vm622_vm0, %v156_v19  ;;  %v158_v20 = vld [vmem:[#allocation2 + $0x22] ss:$8 sm:$0x3] }
  0x2b   :  { %v160_v21 = vld [vmem:[#allocation2 + $0x32] ss:$8 sm:$0x3]  ;;  %176 = vst.msk [vmem:[#allocation5 + $0x44] ss:$8 sm:$0x3] %vm622_vm0, %v158_v20 }
  0x2c   :  { %200 = vst.msk [vmem:[#allocation5 + $0x45] ss:$8 sm:$0x3] %vm622_vm0, %v158_v20  ;;  %179 = vst.msk [vmem:[#allocation5 + $0x64] ss:$8 sm:$0x3] %vm622_vm0, %v160_v21 }
  0x2d   :  { %203 = vst.msk [vmem:[#allocation5 + $0x65] ss:$8 sm:$0x3] %vm622_vm0, %v160_v21  ;;  %v162_v22 = vld [vmem:[#allocation2 + $0x42] ss:$8 sm:$0x3] }
  0x2e   :  { %v164_v23 = vld [vmem:[#allocation2 + $0x52] ss:$8 sm:$0x3]  ;;  %182 = vst.msk [vmem:[#allocation5 + $0x84] ss:$8 sm:$0x3] %vm622_vm0, %v162_v22 }
  0x2f   :  { %206 = vst.msk [vmem:[#allocation5 + $0x85] ss:$8 sm:$0x3] %vm622_vm0, %v162_v22  ;;  %185 = vst.msk [vmem:[#allocation5 + $0xa4] ss:$8 sm:$0x3] %vm622_vm0, %v164_v23 }
  0x30   :  { %209 = vst.msk [vmem:[#allocation5 + $0xa5] ss:$8 sm:$0x3] %vm622_vm0, %v164_v23  ;;  %v166_v24 = vld [vmem:[#allocation2 + $0x62] ss:$8 sm:$0x3] }
  0x31   :  { %v168_v25 = vld [vmem:[#allocation2 + $0x72] ss:$8 sm:$0x3]  ;;  %188 = vst.msk [vmem:[#allocation5 + $0xc4] ss:$8 sm:$0x3] %vm622_vm0, %v166_v24 }
  0x32   :  { %212 = vst.msk [vmem:[#allocation5 + $0xc5] ss:$8 sm:$0x3] %vm622_vm0, %v166_v24  ;;  %191 = vst.msk [vmem:[#allocation5 + $0xe4] ss:$8 sm:$0x3] %vm622_vm0, %v168_v25 }
  0x33   :  { %215 = vst.msk [vmem:[#allocation5 + $0xe5] ss:$8 sm:$0x3] %vm622_vm0, %v168_v25  ;;  %v218_v26 = vld [vmem:[#allocation2 + $0x3] ss:$8 sm:$0x3] }
  0x34   :  { %v220_v27 = vld [vmem:[#allocation2 + $0x13] ss:$8 sm:$0x3]  ;;  %234 = vst.msk [vmem:[#allocation5 + $0x6] ss:$8 sm:$0x3] %vm622_vm0, %v218_v26 }
  0x35   :  { %258 = vst.msk [vmem:[#allocation5 + $0x7] ss:$8 sm:$0x3] %vm622_vm0, %v218_v26  ;;  %237 = vst.msk [vmem:[#allocation5 + $0x26] ss:$8 sm:$0x3] %vm622_vm0, %v220_v27 }
  0x36   :  { %261 = vst.msk [vmem:[#allocation5 + $0x27] ss:$8 sm:$0x3] %vm622_vm0, %v220_v27  ;;  %v222_v28 = vld [vmem:[#allocation2 + $0x23] ss:$8 sm:$0x3] }
  0x37   :  { %v224_v29 = vld [vmem:[#allocation2 + $0x33] ss:$8 sm:$0x3]  ;;  %240 = vst.msk [vmem:[#allocation5 + $0x46] ss:$8 sm:$0x3] %vm622_vm0, %v222_v28 }
  0x38   :  { %264 = vst.msk [vmem:[#allocation5 + $0x47] ss:$8 sm:$0x3] %vm622_vm0, %v222_v28  ;;  %243 = vst.msk [vmem:[#allocation5 + $0x66] ss:$8 sm:$0x3] %vm622_vm0, %v224_v29 }
  0x39   :  { %267 = vst.msk [vmem:[#allocation5 + $0x67] ss:$8 sm:$0x3] %vm622_vm0, %v224_v29  ;;  %v226_v30 = vld [vmem:[#allocation2 + $0x43] ss:$8 sm:$0x3] }
  0x3a   :  { %v228_v31 = vld [vmem:[#allocation2 + $0x53] ss:$8 sm:$0x3]  ;;  %246 = vst.msk [vmem:[#allocation5 + $0x86] ss:$8 sm:$0x3] %vm622_vm0, %v226_v30 }
  0x3b   :  { %270 = vst.msk [vmem:[#allocation5 + $0x87] ss:$8 sm:$0x3] %vm622_vm0, %v226_v30  ;;  %249 = vst.msk [vmem:[#allocation5 + $0xa6] ss:$8 sm:$0x3] %vm622_vm0, %v228_v31 }
  0x3c   :  { %273 = vst.msk [vmem:[#allocation5 + $0xa7] ss:$8 sm:$0x3] %vm622_vm0, %v228_v31  ;;  %v230_v32 = vld [vmem:[#allocation2 + $0x63] ss:$8 sm:$0x3] }
  0x3d   :  { %v232_v33 = vld [vmem:[#allocation2 + $0x73] ss:$8 sm:$0x3]  ;;  %252 = vst.msk [vmem:[#allocation5 + $0xc6] ss:$8 sm:$0x3] %vm622_vm0, %v230_v32 }
  0x3e   :  { %276 = vst.msk [vmem:[#allocation5 + $0xc7] ss:$8 sm:$0x3] %vm622_vm0, %v230_v32  ;;  %255 = vst.msk [vmem:[#allocation5 + $0xe6] ss:$8 sm:$0x3] %vm622_vm0, %v232_v33 }
  0x3f   :  { %279 = vst.msk [vmem:[#allocation5 + $0xe7] ss:$8 sm:$0x3] %vm622_vm0, %v232_v33  ;;  %v282_v34 = vld [vmem:[#allocation2 + $0x4] ss:$8 sm:$0x3] }
  0x40   :  { %v284_v35 = vld [vmem:[#allocation2 + $0x14] ss:$8 sm:$0x3]  ;;  %298 = vst.msk [vmem:[#allocation5 + $0x10] ss:$8 sm:$0x3] %vm622_vm0, %v282_v34 }
  0x41   :  { %322 = vst.msk [vmem:[#allocation5 + $0x11] ss:$8 sm:$0x3] %vm622_vm0, %v282_v34  ;;  %301 = vst.msk [vmem:[#allocation5 + $0x30] ss:$8 sm:$0x3] %vm622_vm0, %v284_v35 }
  0x42   :  { %325 = vst.msk [vmem:[#allocation5 + $0x31] ss:$8 sm:$0x3] %vm622_vm0, %v284_v35  ;;  %v286_v36 = vld [vmem:[#allocation2 + $0x24] ss:$8 sm:$0x3] }
  0x43   :  { %v288_v37 = vld [vmem:[#allocation2 + $0x34] ss:$8 sm:$0x3]  ;;  %304 = vst.msk [vmem:[#allocation5 + $0x50] ss:$8 sm:$0x3] %vm622_vm0, %v286_v36 }
  0x44   :  { %328 = vst.msk [vmem:[#allocation5 + $0x51] ss:$8 sm:$0x3] %vm622_vm0, %v286_v36  ;;  %307 = vst.msk [vmem:[#allocation5 + $0x70] ss:$8 sm:$0x3] %vm622_vm0, %v288_v37 }
  0x45   :  { %331 = vst.msk [vmem:[#allocation5 + $0x71] ss:$8 sm:$0x3] %vm622_vm0, %v288_v37  ;;  %v290_v38 = vld [vmem:[#allocation2 + $0x44] ss:$8 sm:$0x3] }
  0x46   :  { %v292_v39 = vld [vmem:[#allocation2 + $0x54] ss:$8 sm:$0x3]  ;;  %310 = vst.msk [vmem:[#allocation5 + $0x90] ss:$8 sm:$0x3] %vm622_vm0, %v290_v38 }
  0x47   :  { %334 = vst.msk [vmem:[#allocation5 + $0x91] ss:$8 sm:$0x3] %vm622_vm0, %v290_v38  ;;  %313 = vst.msk [vmem:[#allocation5 + $0xb0] ss:$8 sm:$0x3] %vm622_vm0, %v292_v39 }
  0x48   :  { %337 = vst.msk [vmem:[#allocation5 + $0xb1] ss:$8 sm:$0x3] %vm622_vm0, %v292_v39  ;;  %v294_v40 = vld [vmem:[#allocation2 + $0x64] ss:$8 sm:$0x3] }
  0x49   :  { %v296_v41 = vld [vmem:[#allocation2 + $0x74] ss:$8 sm:$0x3]  ;;  %316 = vst.msk [vmem:[#allocation5 + $0xd0] ss:$8 sm:$0x3] %vm622_vm0, %v294_v40 }
  0x4a   :  { %340 = vst.msk [vmem:[#allocation5 + $0xd1] ss:$8 sm:$0x3] %vm622_vm0, %v294_v40  ;;  %319 = vst.msk [vmem:[#allocation5 + $0xf0] ss:$8 sm:$0x3] %vm622_vm0, %v296_v41 }
  0x4b   :  { %343 = vst.msk [vmem:[#allocation5 + $0xf1] ss:$8 sm:$0x3] %vm622_vm0, %v296_v41  ;;  %v346_v42 = vld [vmem:[#allocation2 + $0x5] ss:$8 sm:$0x3] }
  0x4c   :  { %v348_v43 = vld [vmem:[#allocation2 + $0x15] ss:$8 sm:$0x3]  ;;  %362 = vst.msk [vmem:[#allocation5 + $0x12] ss:$8 sm:$0x3] %vm622_vm0, %v346_v42 }
  0x4d   :  { %386 = vst.msk [vmem:[#allocation5 + $0x13] ss:$8 sm:$0x3] %vm622_vm0, %v346_v42  ;;  %365 = vst.msk [vmem:[#allocation5 + $0x32] ss:$8 sm:$0x3] %vm622_vm0, %v348_v43 }
  0x4e   :  { %389 = vst.msk [vmem:[#allocation5 + $0x33] ss:$8 sm:$0x3] %vm622_vm0, %v348_v43  ;;  %v350_v44 = vld [vmem:[#allocation2 + $0x25] ss:$8 sm:$0x3] }
  0x4f   :  { %v352_v45 = vld [vmem:[#allocation2 + $0x35] ss:$8 sm:$0x3]  ;;  %368 = vst.msk [vmem:[#allocation5 + $0x52] ss:$8 sm:$0x3] %vm622_vm0, %v350_v44 }
  0x50   :  { %392 = vst.msk [vmem:[#allocation5 + $0x53] ss:$8 sm:$0x3] %vm622_vm0, %v350_v44  ;;  %371 = vst.msk [vmem:[#allocation5 + $0x72] ss:$8 sm:$0x3] %vm622_vm0, %v352_v45 }
  0x51   :  { %395 = vst.msk [vmem:[#allocation5 + $0x73] ss:$8 sm:$0x3] %vm622_vm0, %v352_v45  ;;  %v354_v46 = vld [vmem:[#allocation2 + $0x45] ss:$8 sm:$0x3] }
  0x52   :  { %v356_v47 = vld [vmem:[#allocation2 + $0x55] ss:$8 sm:$0x3]  ;;  %374 = vst.msk [vmem:[#allocation5 + $0x92] ss:$8 sm:$0x3] %vm622_vm0, %v354_v46 }
  0x53   :  { %398 = vst.msk [vmem:[#allocation5 + $0x93] ss:$8 sm:$0x3] %vm622_vm0, %v354_v46  ;;  %377 = vst.msk [vmem:[#allocation5 + $0xb2] ss:$8 sm:$0x3] %vm622_vm0, %v356_v47 }
  0x54   :  { %401 = vst.msk [vmem:[#allocation5 + $0xb3] ss:$8 sm:$0x3] %vm622_vm0, %v356_v47  ;;  %v358_v48 = vld [vmem:[#allocation2 + $0x65] ss:$8 sm:$0x3] }
  0x55   :  { %v360_v49 = vld [vmem:[#allocation2 + $0x75] ss:$8 sm:$0x3]  ;;  %380 = vst.msk [vmem:[#allocation5 + $0xd2] ss:$8 sm:$0x3] %vm622_vm0, %v358_v48 }
  0x56   :  { %404 = vst.msk [vmem:[#allocation5 + $0xd3] ss:$8 sm:$0x3] %vm622_vm0, %v358_v48  ;;  %383 = vst.msk [vmem:[#allocation5 + $0xf2] ss:$8 sm:$0x3] %vm622_vm0, %v360_v49 }
  0x57   :  { %407 = vst.msk [vmem:[#allocation5 + $0xf3] ss:$8 sm:$0x3] %vm622_vm0, %v360_v49  ;;  %v410_v50 = vld [vmem:[#allocation2 + $0x6] ss:$8 sm:$0x3] }
  0x58   :  { %v412_v51 = vld [vmem:[#allocation2 + $0x16] ss:$8 sm:$0x3]  ;;  %426 = vst.msk [vmem:[#allocation5 + $0x14] ss:$8 sm:$0x3] %vm622_vm0, %v410_v50 }
  0x59   :  { %450 = vst.msk [vmem:[#allocation5 + $0x15] ss:$8 sm:$0x3] %vm622_vm0, %v410_v50  ;;  %429 = vst.msk [vmem:[#allocation5 + $0x34] ss:$8 sm:$0x3] %vm622_vm0, %v412_v51 }
  0x5a   :  { %453 = vst.msk [vmem:[#allocation5 + $0x35] ss:$8 sm:$0x3] %vm622_vm0, %v412_v51  ;;  %v414_v52 = vld [vmem:[#allocation2 + $0x26] ss:$8 sm:$0x3] }
  0x5b   :  { %v416_v53 = vld [vmem:[#allocation2 + $0x36] ss:$8 sm:$0x3]  ;;  %432 = vst.msk [vmem:[#allocation5 + $0x54] ss:$8 sm:$0x3] %vm622_vm0, %v414_v52 }
  0x5c   :  { %456 = vst.msk [vmem:[#allocation5 + $0x55] ss:$8 sm:$0x3] %vm622_vm0, %v414_v52  ;;  %435 = vst.msk [vmem:[#allocation5 + $0x74] ss:$8 sm:$0x3] %vm622_vm0, %v416_v53 }
  0x5d   :  { %459 = vst.msk [vmem:[#allocation5 + $0x75] ss:$8 sm:$0x3] %vm622_vm0, %v416_v53  ;;  %v418_v54 = vld [vmem:[#allocation2 + $0x46] ss:$8 sm:$0x3] }
  0x5e   :  { %v420_v55 = vld [vmem:[#allocation2 + $0x56] ss:$8 sm:$0x3]  ;;  %438 = vst.msk [vmem:[#allocation5 + $0x94] ss:$8 sm:$0x3] %vm622_vm0, %v418_v54 }
  0x5f   :  { %462 = vst.msk [vmem:[#allocation5 + $0x95] ss:$8 sm:$0x3] %vm622_vm0, %v418_v54  ;;  %441 = vst.msk [vmem:[#allocation5 + $0xb4] ss:$8 sm:$0x3] %vm622_vm0, %v420_v55 }
  0x60   :  { %465 = vst.msk [vmem:[#allocation5 + $0xb5] ss:$8 sm:$0x3] %vm622_vm0, %v420_v55  ;;  %v422_v56 = vld [vmem:[#allocation2 + $0x66] ss:$8 sm:$0x3] }
  0x61   :  { %v424_v57 = vld [vmem:[#allocation2 + $0x76] ss:$8 sm:$0x3]  ;;  %444 = vst.msk [vmem:[#allocation5 + $0xd4] ss:$8 sm:$0x3] %vm622_vm0, %v422_v56 }
  0x62   :  { %468 = vst.msk [vmem:[#allocation5 + $0xd5] ss:$8 sm:$0x3] %vm622_vm0, %v422_v56  ;;  %447 = vst.msk [vmem:[#allocation5 + $0xf4] ss:$8 sm:$0x3] %vm622_vm0, %v424_v57 }
  0x63   :  { %471 = vst.msk [vmem:[#allocation5 + $0xf5] ss:$8 sm:$0x3] %vm622_vm0, %v424_v57  ;;  %v474_v58 = vld [vmem:[#allocation2 + $0x7] ss:$8 sm:$0x3] }
  0x64   :  { %v476_v59 = vld [vmem:[#allocation2 + $0x17] ss:$8 sm:$0x3]  ;;  %490 = vst.msk [vmem:[#allocation5 + $0x16] ss:$8 sm:$0x3] %vm622_vm0, %v474_v58 }
  0x65   :  { %514 = vst.msk [vmem:[#allocation5 + $0x17] ss:$8 sm:$0x3] %vm622_vm0, %v474_v58  ;;  %493 = vst.msk [vmem:[#allocation5 + $0x36] ss:$8 sm:$0x3] %vm622_vm0, %v476_v59 }
  0x66   :  { %517 = vst.msk [vmem:[#allocation5 + $0x37] ss:$8 sm:$0x3] %vm622_vm0, %v476_v59  ;;  %v478_v60 = vld [vmem:[#allocation2 + $0x27] ss:$8 sm:$0x3] }
  0x67   :  { %v480_v61 = vld [vmem:[#allocation2 + $0x37] ss:$8 sm:$0x3]  ;;  %496 = vst.msk [vmem:[#allocation5 + $0x56] ss:$8 sm:$0x3] %vm622_vm0, %v478_v60 }
  0x68   :  { %520 = vst.msk [vmem:[#allocation5 + $0x57] ss:$8 sm:$0x3] %vm622_vm0, %v478_v60  ;;  %499 = vst.msk [vmem:[#allocation5 + $0x76] ss:$8 sm:$0x3] %vm622_vm0, %v480_v61 }
  0x69   :  { %523 = vst.msk [vmem:[#allocation5 + $0x77] ss:$8 sm:$0x3] %vm622_vm0, %v480_v61  ;;  %v482_v62 = vld [vmem:[#allocation2 + $0x47] ss:$8 sm:$0x3] }
  0x6a   :  { %v484_v63 = vld [vmem:[#allocation2 + $0x57] ss:$8 sm:$0x3]  ;;  %502 = vst.msk [vmem:[#allocation5 + $0x96] ss:$8 sm:$0x3] %vm622_vm0, %v482_v62 }
  0x6b   :  { %526 = vst.msk [vmem:[#allocation5 + $0x97] ss:$8 sm:$0x3] %vm622_vm0, %v482_v62  ;;  %505 = vst.msk [vmem:[#allocation5 + $0xb6] ss:$8 sm:$0x3] %vm622_vm0, %v484_v63 }
  0x6c   :  { %529 = vst.msk [vmem:[#allocation5 + $0xb7] ss:$8 sm:$0x3] %vm622_vm0, %v484_v63  ;;  %v486_v0 = vld [vmem:[#allocation2 + $0x67] ss:$8 sm:$0x3] }
  0x6d   :  { %v488_v2 = vld [vmem:[#allocation2 + $0x77] ss:$8 sm:$0x3]  ;;  %508 = vst.msk [vmem:[#allocation5 + $0xd6] ss:$8 sm:$0x3] %vm622_vm0, %v486_v0 }
  0x6e   :  { %532 = vst.msk [vmem:[#allocation5 + $0xd7] ss:$8 sm:$0x3] %vm622_vm0, %v486_v0  ;;  %511 = vst.msk [vmem:[#allocation5 + $0xf6] ss:$8 sm:$0x3] %vm622_vm0, %v488_v2 }
  0x6f   :  { %535 = vst.msk [vmem:[#allocation5 + $0xf7] ss:$8 sm:$0x3] %vm622_vm0, %v488_v2 }
  0x70   :  { %589 = shalt.err (!%p586_p9)
}
  0x71   :  { %548 = dma.vmem_to_hbm [thread:$0]  %s543_s14, 4096, %s892_s1, [#allocation4], %s603_s9, %s603_s9, %s604_s10  }
  0x72   :  { %600 = dma.done.wait [#allocation4], 4096  }
  0x73   :  { %601 = vsyncadd [#allocation4], 4294963200 }
  0x74   :  { %552 = vsyncpa [#allocation3], 1 }
  0x75   :  { %553 = vsyncpa [#allocation4], 1 }

</bundles_post_ra>
